<compile_context>
chip_gen: v5e
topology: v5e:2x2
jax: 0.10.0
libtpu: 0.0.40
codegen_flags: <defaults>
</compile_context>

<pallas_src>
import functools

import jax
import jax.numpy as jnp
from jax.experimental import pallas as pl
from jax.experimental.pallas import tpu as pltpu

WINDOW = 3
PAD = WINDOW // 2
C1 = 0.01 ** 2
C2 = 0.03 ** 2


def _pack_factor(nc, w, lane_cap=512):
    """How many planes to pack along the lane axis (must divide nc)."""
    if w >= 128:
        return 1
    best = 1
    for k in range(1, nc + 1):
        if nc % k or k * w > lane_cap:
            continue
        if (k * w) % 128 == 0:
            return k          # smallest k giving a lane-dense multiple of 128
        if k * w <= 128:
            best = k          # otherwise largest k that stays within one vreg row
    return best


def _ssim_kernel(x_ref, y_ref, o_ref, *, win_w):
    # x_ref, y_ref, o_ref: (1, H, L) with L = K * win_w planes packed on lanes.
    xp = x_ref[0].astype(jnp.float32)
    yp = y_ref[0].astype(jnp.float32)
    H, L = xp.shape
    W = win_w

    # Boundary masks (computed once, reused for all 5 statistic planes).
    col = jax.lax.broadcasted_iota(jnp.int32, (H, L), 1) % W
    row = jax.lax.broadcasted_iota(jnp.int32, (H, L), 0)
    first_col = col == 0
    last_col = col == (W - 1)
    first_row = row == 0
    last_row = row == (H - 1)

    def hsum3(a):
        # 3-tap sum along lanes with per-segment reflection (pad=1).
        a_m1 = pltpu.roll(a, 1, axis=1)        # a[..., j-1] (wrapped)
        a_p1 = pltpu.roll(a, L - 1, axis=1)    # a[..., j+1] (wrapped)
        left = jnp.where(first_col, a_p1, a_m1)
        right = jnp.where(last_col, a_m1, a_p1)
        return left + a + right

    def vsum3(a):
        # 3-tap sum along sublanes (rows) with reflection (pad=1).
        a_m1 = pltpu.roll(a, 1, axis=0)        # a[i-1, ...] (wrapped)
        a_p1 = pltpu.roll(a, H - 1, axis=0)    # a[i+1, ...] (wrapped)
        up = jnp.where(first_row, a_p1, a_m1)
        down = jnp.where(last_row, a_m1, a_p1)
        return up + a + down

    inv_n = 1.0 / float(WINDOW * WINDOW)

    def pool(a):
        return vsum3(hsum3(a)) * inv_n

    # Products computed once (not per tap).
    xx = xp * xp
    yy = yp * yp
    xy = xp * yp

    mu_x = pool(xp)
    mu_y = pool(yp)
    sigma_x = pool(xx) - mu_x * mu_x
    sigma_y = pool(yy) - mu_y * mu_y
    sigma_xy = pool(xy) - mu_x * mu_y

    ssim_n = (2.0 * mu_x * mu_y + C1) * (2.0 * sigma_xy + C2)
    ssim_d = (mu_x * mu_x + mu_y * mu_y + C1) * (sigma_x + sigma_y + C2)

    # Division on the EUP slot: approx reciprocal + one Newton step.
    inv_d = pl.reciprocal(ssim_d, approx=True)
    inv_d = inv_d * (2.0 - ssim_d * inv_d)

    out = (1.0 - ssim_n * inv_d) * 0.5
    o_ref[0] = jnp.clip(out, 0.0, 1.0).astype(o_ref.dtype)


def ssim(x, y):
    """x, y: (N, C, H, W). Returns (N, C, H, W) SSIM distance map."""
    N, C, H, W = x.shape
    assert y.shape == x.shape
    nc = N * C

    # Pack K planes along the lane axis so the last dim is lane-dense.
    K = _pack_factor(nc, W)
    G = nc // K
    L = K * W

    def pack(a):
        a = a.reshape(G, K, H, W)
        a = jnp.transpose(a, (0, 2, 1, 3))
        return a.reshape(G, H, L)

    xp = pack(x)
    yp = pack(y)

    kernel = functools.partial(_ssim_kernel, win_w=W)

    out = pl.pallas_call(
        kernel,
        out_shape=jax.ShapeDtypeStruct((G, H, L), x.dtype),
        grid_spec=pltpu.PrefetchScalarGridSpec(
            num_scalar_prefetch=0,
            grid=(G,),
            in_specs=[
                pl.BlockSpec((1, H, L), lambda i: (i, 0, 0)),
                pl.BlockSpec((1, H, L), lambda i: (i, 0, 0)),
            ],
            out_specs=pl.BlockSpec((1, H, L), lambda i: (i, 0, 0)),
        ),
        compiler_params=pltpu.CompilerParams(
            dimension_semantics=("parallel",)),
    )(xp, yp)

    out = out.reshape(G, H, K, W)
    out = jnp.transpose(out, (0, 2, 1, 3))
    return out.reshape(N, C, H, W)


def _ssim_ref(x, y):
    """Pure-JAX reference matching the PyTorch module."""
    xp = jnp.pad(x, ((0, 0), (0, 0), (PAD, PAD), (PAD, PAD)), mode="reflect")
    yp = jnp.pad(y, ((0, 0), (0, 0), (PAD, PAD), (PAD, PAD)), mode="reflect")

    def pool(a):
        return jax.lax.reduce_window(
            a, 0.0, jax.lax.add, (1, 1, WINDOW, WINDOW), (1, 1, 1, 1),
            "VALID") / (WINDOW * WINDOW)

    mu_x = pool(xp)
    mu_y = pool(yp)
    sigma_x = pool(xp * xp) - mu_x ** 2
    sigma_y = pool(yp * yp) - mu_y ** 2
    sigma_xy = pool(xp * yp) - mu_x * mu_y
    ssim_n = (2 * mu_x * mu_y + C1) * (2 * sigma_xy + C2)
    ssim_d = (mu_x ** 2 + mu_y ** 2 + C1) * (sigma_x + sigma_y + C2)
    return jnp.clip((1 - ssim_n / ssim_d) / 2, 0.0, 1.0)


if __name__ == "__main__":
    key = jax.random.PRNGKey(0)
    kx, ky = jax.random.split(key)
    N, C, H, W = 2, 4, 16, 16
    x = jax.random.uniform(kx, (N, C, H, W), dtype=jnp.float32)
    y = jax.random.uniform(ky, (N, C, H, W), dtype=jnp.float32)

    out = ssim(x, y)
    out = jax.block_until_ready(out)

    ref = _ssim_ref(x, y)
    assert out.shape == (N, C, H, W)
    assert jnp.allclose(out, ref, atol=1e-5, rtol=1e-5)
    print("KERNEL_OK")
</pallas_src>

<mosaic_0001>
module attributes {stable_mosaic.version = 11 : i64} {
  func.func @_ssim_kernel(%arg0: i32, %arg1: memref<1x16x128xf32, #tpu.memory_space<vmem>>, %arg2: memref<1x16x128xf32, #tpu.memory_space<vmem>>, %arg3: memref<1x16x128xf32, #tpu.memory_space<vmem>>) attributes {dimension_semantics = [#tpu.dimension_semantics<parallel>], iteration_bounds = array<i64: 1>, scalar_prefetch = 0 : i64, scratch_operands = 0 : i64, tpu.core_type = #tpu.core_type<tc>, window_params = [{transform_indices = @transform_0, window_bounds = array<i64: 1, 16, 128>}, {transform_indices = @transform_1, window_bounds = array<i64: 1, 16, 128>}, {transform_indices = @transform_2, window_bounds = array<i64: 1, 16, 128>}]} {
    %c0 = arith.constant 0 : index
    %c0_0 = arith.constant 0 : index
    %c0_1 = arith.constant 0 : index
    %0 = vector.load %arg1[%c0, %c0_0, %c0_1] : memref<1x16x128xf32, #tpu.memory_space<vmem>>, vector<1x16x128xf32>
    %1 = vector.shape_cast %0 : vector<1x16x128xf32> to vector<16x128xf32>
    %c0_2 = arith.constant 0 : index
    %c0_3 = arith.constant 0 : index
    %c0_4 = arith.constant 0 : index
    %2 = vector.load %arg2[%c0_2, %c0_3, %c0_4] : memref<1x16x128xf32, #tpu.memory_space<vmem>>, vector<1x16x128xf32>
    %3 = vector.shape_cast %2 : vector<1x16x128xf32> to vector<16x128xf32>
    %4 = tpu.iota {dimensions = array<i32: 1>} : vector<16x128xi32>
    %c16_i32 = arith.constant 16 : i32
    %c0_i32 = arith.constant 0 : i32
    %5 = arith.cmpi eq, %c16_i32, %c0_i32 : i32
    %c1_i32 = arith.constant 1 : i32
    %6 = arith.select %5, %c1_i32, %c16_i32 : i32
    %7 = vector.broadcast %6 : i32 to vector<16x128xi32>
    %8 = arith.remsi %4, %7 : vector<16x128xi32>
    %c0_i32_5 = arith.constant 0 : i32
    %9 = vector.broadcast %c0_i32_5 : i32 to vector<16x128xi32>
    %10 = arith.cmpi ne, %8, %9 : vector<16x128xi32>
    %c0_i32_6 = arith.constant 0 : i32
    %11 = vector.broadcast %c0_i32_6 : i32 to vector<16x128xi32>
    %12 = arith.cmpi slt, %8, %11 : vector<16x128xi32>
    %c0_i32_7 = arith.constant 0 : i32
    %13 = arith.cmpi slt, %6, %c0_i32_7 : i32
    %14 = vector.broadcast %13 : i1 to vector<16x128xi1>
    %15 = vector.broadcast %14 : vector<16x128xi1> to vector<16x128xi1>
    %16 = arith.xori %12, %15 : vector<16x128xi1>
    %17 = arith.andi %16, %10 : vector<16x128xi1>
    %18 = vector.broadcast %6 : i32 to vector<16x128xi32>
    %19 = arith.addi %8, %18 : vector<16x128xi32>
    %20 = arith.select %17, %19, %8 : vector<16x128xi1>, vector<16x128xi32>
    %21 = tpu.iota {dimensions = array<i32: 0>} : vector<16x128xi32>
    %c0_i32_8 = arith.constant 0 : i32
    %22 = vector.broadcast %c0_i32_8 : i32 to vector<16x128xi32>
    %23 = arith.cmpi eq, %20, %22 : vector<16x128xi32>
    %c15_i32 = arith.constant 15 : i32
    %24 = vector.broadcast %c15_i32 : i32 to vector<16x128xi32>
    %25 = arith.cmpi eq, %20, %24 : vector<16x128xi32>
    %c0_i32_9 = arith.constant 0 : i32
    %26 = vector.broadcast %c0_i32_9 : i32 to vector<16x128xi32>
    %27 = arith.cmpi eq, %21, %26 : vector<16x128xi32>
    %c15_i32_10 = arith.constant 15 : i32
    %28 = vector.broadcast %c15_i32_10 : i32 to vector<16x128xi32>
    %29 = arith.cmpi eq, %21, %28 : vector<16x128xi32>
    %30 = arith.mulf %1, %1 : vector<16x128xf32>
    %31 = arith.mulf %3, %3 : vector<16x128xf32>
    %32 = arith.mulf %1, %3 : vector<16x128xf32>
    %c1_i32_11 = arith.constant 1 : i32
    %33 = tpu.dynamic_rotate %1 by %c1_i32_11 dim 1 : vector<16x128xf32>, i32 -> vector<16x128xf32>
    %c127_i32 = arith.constant 127 : i32
    %34 = tpu.dynamic_rotate %1 by %c127_i32 dim 1 : vector<16x128xf32>, i32 -> vector<16x128xf32>
    %35 = arith.select %23, %34, %33 : vector<16x128xi1>, vector<16x128xf32>
    %36 = arith.select %25, %33, %34 : vector<16x128xi1>, vector<16x128xf32>
    %37 = arith.addf %35, %1 : vector<16x128xf32>
    %38 = arith.addf %37, %36 : vector<16x128xf32>
    %c1_i32_12 = arith.constant 1 : i32
    %39 = tpu.dynamic_rotate %38 by %c1_i32_12 dim 0 : vector<16x128xf32>, i32 -> vector<16x128xf32>
    %c15_i32_13 = arith.constant 15 : i32
    %40 = tpu.dynamic_rotate %38 by %c15_i32_13 dim 0 : vector<16x128xf32>, i32 -> vector<16x128xf32>
    %41 = arith.select %27, %40, %39 : vector<16x128xi1>, vector<16x128xf32>
    %42 = arith.select %29, %39, %40 : vector<16x128xi1>, vector<16x128xf32>
    %43 = arith.addf %41, %38 : vector<16x128xf32>
    %44 = arith.addf %43, %42 : vector<16x128xf32>
    %cst = arith.constant 0.111111112 : f32
    %45 = vector.broadcast %cst : f32 to vector<16x128xf32>
    %46 = arith.mulf %44, %45 : vector<16x128xf32>
    %c1_i32_14 = arith.constant 1 : i32
    %47 = tpu.dynamic_rotate %3 by %c1_i32_14 dim 1 : vector<16x128xf32>, i32 -> vector<16x128xf32>
    %c127_i32_15 = arith.constant 127 : i32
    %48 = tpu.dynamic_rotate %3 by %c127_i32_15 dim 1 : vector<16x128xf32>, i32 -> vector<16x128xf32>
    %49 = arith.select %23, %48, %47 : vector<16x128xi1>, vector<16x128xf32>
    %50 = arith.select %25, %47, %48 : vector<16x128xi1>, vector<16x128xf32>
    %51 = arith.addf %49, %3 : vector<16x128xf32>
    %52 = arith.addf %51, %50 : vector<16x128xf32>
    %c1_i32_16 = arith.constant 1 : i32
    %53 = tpu.dynamic_rotate %52 by %c1_i32_16 dim 0 : vector<16x128xf32>, i32 -> vector<16x128xf32>
    %c15_i32_17 = arith.constant 15 : i32
    %54 = tpu.dynamic_rotate %52 by %c15_i32_17 dim 0 : vector<16x128xf32>, i32 -> vector<16x128xf32>
    %55 = arith.select %27, %54, %53 : vector<16x128xi1>, vector<16x128xf32>
    %56 = arith.select %29, %53, %54 : vector<16x128xi1>, vector<16x128xf32>
    %57 = arith.addf %55, %52 : vector<16x128xf32>
    %58 = arith.addf %57, %56 : vector<16x128xf32>
    %cst_18 = arith.constant 0.111111112 : f32
    %59 = vector.broadcast %cst_18 : f32 to vector<16x128xf32>
    %60 = arith.mulf %58, %59 : vector<16x128xf32>
    %c1_i32_19 = arith.constant 1 : i32
    %61 = tpu.dynamic_rotate %30 by %c1_i32_19 dim 1 : vector<16x128xf32>, i32 -> vector<16x128xf32>
    %c127_i32_20 = arith.constant 127 : i32
    %62 = tpu.dynamic_rotate %30 by %c127_i32_20 dim 1 : vector<16x128xf32>, i32 -> vector<16x128xf32>
    %63 = arith.select %23, %62, %61 : vector<16x128xi1>, vector<16x128xf32>
    %64 = arith.select %25, %61, %62 : vector<16x128xi1>, vector<16x128xf32>
    %65 = arith.addf %63, %30 : vector<16x128xf32>
    %66 = arith.addf %65, %64 : vector<16x128xf32>
    %c1_i32_21 = arith.constant 1 : i32
    %67 = tpu.dynamic_rotate %66 by %c1_i32_21 dim 0 : vector<16x128xf32>, i32 -> vector<16x128xf32>
    %c15_i32_22 = arith.constant 15 : i32
    %68 = tpu.dynamic_rotate %66 by %c15_i32_22 dim 0 : vector<16x128xf32>, i32 -> vector<16x128xf32>
    %69 = arith.select %27, %68, %67 : vector<16x128xi1>, vector<16x128xf32>
    %70 = arith.select %29, %67, %68 : vector<16x128xi1>, vector<16x128xf32>
    %71 = arith.addf %69, %66 : vector<16x128xf32>
    %72 = arith.addf %71, %70 : vector<16x128xf32>
    %cst_23 = arith.constant 0.111111112 : f32
    %73 = vector.broadcast %cst_23 : f32 to vector<16x128xf32>
    %74 = arith.mulf %72, %73 : vector<16x128xf32>
    %75 = arith.mulf %46, %46 : vector<16x128xf32>
    %76 = arith.subf %74, %75 : vector<16x128xf32>
    %c1_i32_24 = arith.constant 1 : i32
    %77 = tpu.dynamic_rotate %31 by %c1_i32_24 dim 1 : vector<16x128xf32>, i32 -> vector<16x128xf32>
    %c127_i32_25 = arith.constant 127 : i32
    %78 = tpu.dynamic_rotate %31 by %c127_i32_25 dim 1 : vector<16x128xf32>, i32 -> vector<16x128xf32>
    %79 = arith.select %23, %78, %77 : vector<16x128xi1>, vector<16x128xf32>
    %80 = arith.select %25, %77, %78 : vector<16x128xi1>, vector<16x128xf32>
    %81 = arith.addf %79, %31 : vector<16x128xf32>
    %82 = arith.addf %81, %80 : vector<16x128xf32>
    %c1_i32_26 = arith.constant 1 : i32
    %83 = tpu.dynamic_rotate %82 by %c1_i32_26 dim 0 : vector<16x128xf32>, i32 -> vector<16x128xf32>
    %c15_i32_27 = arith.constant 15 : i32
    %84 = tpu.dynamic_rotate %82 by %c15_i32_27 dim 0 : vector<16x128xf32>, i32 -> vector<16x128xf32>
    %85 = arith.select %27, %84, %83 : vector<16x128xi1>, vector<16x128xf32>
    %86 = arith.select %29, %83, %84 : vector<16x128xi1>, vector<16x128xf32>
    %87 = arith.addf %85, %82 : vector<16x128xf32>
    %88 = arith.addf %87, %86 : vector<16x128xf32>
    %cst_28 = arith.constant 0.111111112 : f32
    %89 = vector.broadcast %cst_28 : f32 to vector<16x128xf32>
    %90 = arith.mulf %88, %89 : vector<16x128xf32>
    %91 = arith.mulf %60, %60 : vector<16x128xf32>
    %92 = arith.subf %90, %91 : vector<16x128xf32>
    %c1_i32_29 = arith.constant 1 : i32
    %93 = tpu.dynamic_rotate %32 by %c1_i32_29 dim 1 : vector<16x128xf32>, i32 -> vector<16x128xf32>
    %c127_i32_30 = arith.constant 127 : i32
    %94 = tpu.dynamic_rotate %32 by %c127_i32_30 dim 1 : vector<16x128xf32>, i32 -> vector<16x128xf32>
    %95 = arith.select %23, %94, %93 : vector<16x128xi1>, vector<16x128xf32>
    %96 = arith.select %25, %93, %94 : vector<16x128xi1>, vector<16x128xf32>
    %97 = arith.addf %95, %32 : vector<16x128xf32>
    %98 = arith.addf %97, %96 : vector<16x128xf32>
    %c1_i32_31 = arith.constant 1 : i32
    %99 = tpu.dynamic_rotate %98 by %c1_i32_31 dim 0 : vector<16x128xf32>, i32 -> vector<16x128xf32>
    %c15_i32_32 = arith.constant 15 : i32
    %100 = tpu.dynamic_rotate %98 by %c15_i32_32 dim 0 : vector<16x128xf32>, i32 -> vector<16x128xf32>
    %101 = arith.select %27, %100, %99 : vector<16x128xi1>, vector<16x128xf32>
    %102 = arith.select %29, %99, %100 : vector<16x128xi1>, vector<16x128xf32>
    %103 = arith.addf %101, %98 : vector<16x128xf32>
    %104 = arith.addf %103, %102 : vector<16x128xf32>
    %cst_33 = arith.constant 0.111111112 : f32
    %105 = vector.broadcast %cst_33 : f32 to vector<16x128xf32>
    %106 = arith.mulf %104, %105 : vector<16x128xf32>
    %107 = arith.mulf %46, %60 : vector<16x128xf32>
    %108 = arith.subf %106, %107 : vector<16x128xf32>
    %cst_34 = arith.constant 2.000000e+00 : f32
    %109 = vector.broadcast %cst_34 : f32 to vector<16x128xf32>
    %110 = arith.mulf %109, %46 : vector<16x128xf32>
    %111 = arith.mulf %110, %60 : vector<16x128xf32>
    %cst_35 = arith.constant 9.99999974E-5 : f32
    %112 = vector.broadcast %cst_35 : f32 to vector<16x128xf32>
    %113 = arith.addf %111, %112 : vector<16x128xf32>
    %cst_36 = arith.constant 2.000000e+00 : f32
    %114 = vector.broadcast %cst_36 : f32 to vector<16x128xf32>
    %115 = arith.mulf %114, %108 : vector<16x128xf32>
    %cst_37 = arith.constant 8.99999984E-4 : f32
    %116 = vector.broadcast %cst_37 : f32 to vector<16x128xf32>
    %117 = arith.addf %115, %116 : vector<16x128xf32>
    %118 = arith.mulf %113, %117 : vector<16x128xf32>
    %119 = arith.mulf %46, %46 : vector<16x128xf32>
    %120 = arith.mulf %60, %60 : vector<16x128xf32>
    %121 = arith.addf %119, %120 : vector<16x128xf32>
    %cst_38 = arith.constant 9.99999974E-5 : f32
    %122 = vector.broadcast %cst_38 : f32 to vector<16x128xf32>
    %123 = arith.addf %121, %122 : vector<16x128xf32>
    %124 = arith.addf %76, %92 : vector<16x128xf32>
    %cst_39 = arith.constant 8.99999984E-4 : f32
    %125 = vector.broadcast %cst_39 : f32 to vector<16x128xf32>
    %126 = arith.addf %124, %125 : vector<16x128xf32>
    %127 = arith.mulf %123, %126 : vector<16x128xf32>
    %128 = tpu.reciprocal %127 {approx = true} : vector<16x128xf32> -> vector<16x128xf32>
    %129 = arith.mulf %127, %128 : vector<16x128xf32>
    %cst_40 = arith.constant 2.000000e+00 : f32
    %130 = vector.broadcast %cst_40 : f32 to vector<16x128xf32>
    %131 = arith.subf %130, %129 : vector<16x128xf32>
    %132 = arith.mulf %128, %131 : vector<16x128xf32>
    %133 = arith.mulf %118, %132 : vector<16x128xf32>
    %cst_41 = arith.constant 1.000000e+00 : f32
    %134 = vector.broadcast %cst_41 : f32 to vector<16x128xf32>
    %135 = arith.subf %134, %133 : vector<16x128xf32>
    %cst_42 = arith.constant 5.000000e-01 : f32
    %136 = vector.broadcast %cst_42 : f32 to vector<16x128xf32>
    %137 = arith.mulf %135, %136 : vector<16x128xf32>
    %cst_43 = arith.constant 0.000000e+00 : f32
    %cst_44 = arith.constant 1.000000e+00 : f32
    %138 = vector.broadcast %cst_43 : f32 to vector<16x128xf32>
    %139 = arith.maximumf %138, %137 : vector<16x128xf32>
    %140 = vector.broadcast %cst_44 : f32 to vector<16x128xf32>
    %141 = arith.minimumf %140, %139 : vector<16x128xf32>
    %c0_45 = arith.constant 0 : index
    %c0_46 = arith.constant 0 : index
    %c0_47 = arith.constant 0 : index
    %142 = vector.load %arg3[%c0_45, %c0_46, %c0_47] : memref<1x16x128xf32, #tpu.memory_space<vmem>>, vector<1x16x128xf32>
    %143 = vector.shape_cast %142 : vector<1x16x128xf32> to vector<16x128xf32>
    %144 = vector.shape_cast %141 : vector<16x128xf32> to vector<1x16x128xf32>
    tpu.vector_store %arg3[%c0_45, %c0_46, %c0_47], %144 {strides = array<i32>} : memref<1x16x128xf32, #tpu.memory_space<vmem>>, vector<1x16x128xf32>,
    return
  }
  func.func @transform_0(%arg0: i32) -> (i32, i32, i32) {
    %c0_i32 = arith.constant 0 : i32
    %c0_i32_0 = arith.constant 0 : i32
    %c0_i32_1 = arith.constant 0 : i32
    return %arg0, %c0_i32, %c0_i32_0 : i32, i32, i32
  }
  func.func @transform_1(%arg0: i32) -> (i32, i32, i32) {
    %c0_i32 = arith.constant 0 : i32
    %c0_i32_0 = arith.constant 0 : i32
    %c0_i32_1 = arith.constant 0 : i32
    return %arg0, %c0_i32, %c0_i32_0 : i32, i32, i32
  }
  func.func @transform_2(%arg0: i32) -> (i32, i32, i32) {
    %c0_i32 = arith.constant 0 : i32
    %c0_i32_0 = arith.constant 0 : i32
    %c0_i32_1 = arith.constant 0 : i32
    return %arg0, %c0_i32, %c0_i32_0 : i32, i32, i32
  }
}

</mosaic_0001>

<bundles_post_ra>
// kernel: tpu_custom_call.1
= control target key start
LH: loop header
LB: loop body
LE: loop exit
PB: predicated region body
PF: predicated region fallthrough
CT: control target
= control target key end

     0   :  { %7 = vsyncpa [#allocation3], 0  ;;  %s618_s0 = inlined_call_operand.hbm [shape: f32[1,16,128], index: 0, kind: input, shape index: {}]   ;;  %s619_s1 = inlined_call_operand.hbm [shape: f32[1,16,128], index: 1, kind: input, shape index: {}]   ;;  %s620_s2 = inlined_call_operand.hbm [shape: f32[1,16,128], index: 2, kind: output, shape index: {}]  }
   0x1   :  { %8 = vsyncpa [#allocation6], 0 }
   0x2   :  { %9 = vsyncpa [#allocation4], 0  ;;  %s14_s11 = sshll.u32 %s618_s0, 4  ;;  %s412_s12 = smov [#allocation2]   ;;  %s15_s11 = int_to_ptr.hbm [resolvable:$true] %s14_s11 }
   0x3   :  { %s16_s13 = sshll.u32 %s412_s12, 4  ;;  %s27_s16 = sshll.u32 %s619_s1, 4  ;;  %s17_s13 = int_to_ptr.vmem [resolvable:$true] %s16_s13  ;;  %s28_s16 = int_to_ptr.hbm [resolvable:$true] %s27_s16 }
   0x4   :  { %s413_s17 = smov 128   ;;  %s414_s18 = smov 8  }
   0x5   :  { %22 = dma.hbm_to_vmem [thread:$0]  %s15_s11, 256, %s17_s13, [#allocation3], %s413_s17, %s413_s17, %s414_s18  }
   0x6   :  { %s415_s19 = smov [#allocation5]  }
   0x7   :  { %s29_s20 = sshll.u32 %s415_s19, 4  ;;  %s30_s20 = int_to_ptr.vmem [resolvable:$true] %s29_s20 }
   0x8   :  { %35 = dma.hbm_to_vmem [thread:$0]  %s28_s16, 256, %s30_s20, [#allocation6], %s413_s17, %s413_s17, %s414_s18  }
   0x9   :  { %406 = dma.done.wait [#allocation3], 256  }
   0xa   :  { %407 = vsyncadd [#allocation3], 4294967040 }
   0xb   :  { %408 = dma.done.wait [#allocation6], 256  }
   0xc   :  { %409 = vsyncadd [#allocation6], 4294967040  ;;  %v44_v0 = vld [vmem:[#allocation2] sm:$0xff]  ;;  %s416_s0 = smov 127   ;;  %s417_s1 = smov 1   ;;  %v46_v1 = vld [vmem:[#allocation5] sm:$0xff]  ;;  %v48_v14 = vlaneseq }
   0xd   :  { %81 = vrot.lane.b32.xlu1 %v44_v0, %s416_s0  ;;  %77 = vrot.lane.b32.xlu0 %v44_v0, %s417_s1  ;;  %v45_v2 = vld [vmem:[#allocation2 + $0x8] sm:$0xff]  ;;  %v47_v3 = vld [vmem:[#allocation5 + $0x8] sm:$0xff]  ;;  %v71_v4 = vmul.f32 %v44_v0, %v44_v0  ;;  %v450_v6 = vmul.f32 %v46_v1, %v46_v1  ;;  %v457_v8 = vmul.f32 %v46_v1, %v44_v0  ;;  %s418_s21 = smov [#allocation7]   ;;  %s309_s25 = sshll.u32 %s620_s2, 4  ;;  %s310_s25 = int_to_ptr.hbm [resolvable:$true] %s309_s25 }
   0xe   :  { %113 = vrot.lane.b32.xlu2 %v46_v1, %s417_s1  ;;  %v446_v5 = vmul.f32 %v45_v2, %v45_v2  ;;  %v452_v7 = vmul.f32 %v47_v3, %v47_v3  ;;  %v459_v9 = vmul.f32 %v47_v3, %v45_v2  ;;  %v49_v15 = vand.u32 127, %v48_v14  ;;  %s307_s22 = sshll.u32 %s418_s21, 4  ;;  %s308_s22 = int_to_ptr.vmem [resolvable:$true] %s307_s22 }
   0xf   :  { %v482_v32 = vshrl.u32 %v48_v14, 7 }
  0x10   :  { %v54_v18 = vand.u32 15, %v49_v15 }
  0x11   :  { %v493_v44 = vadd.s32 8, %v482_v32  ;;  %vm95_vm2 = vcmp.lt.s32.totalorder %v482_v32, 1  ;;  %vm100_vm3 = vcmp.lt.s32.totalorder %v482_v32, 7  ;;  %vm67_vm4 = vcmp.eq.s32.totalorder %v482_v32, 0 }
  0x12   :  { %vm466_vm0 = vcmp.eq.s32.totalorder %v54_v18, 0  ;;  %vm478_vm1 = vcmp.eq.s32.totalorder %v54_v18, 15 }
  0x13   :  { %vm70_vm5 = vcmp.eq.s32.totalorder %v493_v44, 15 }
  0x15   :  { %83 = vrot.lane.b32.xlu1 %v45_v2, %s416_s0  ;;  %79 = vrot.lane.b32.xlu0 %v45_v2, %s417_s1 }
  0x16   :  { %115 = vrot.lane.b32.xlu2 %v47_v3, %s417_s1 }
  0x1d   :  { %119 = vrot.lane.b32.xlu1 %v47_v3, %s416_s0  ;;  %117 = vrot.lane.b32.xlu0 %v46_v1, %s416_s0 }
  0x1e   :  { %147 = vrot.lane.b32.xlu2 %v71_v4, %s417_s1 }
  0x25   :  { %149 = vrot.lane.b32.xlu0 %v446_v5, %s417_s1  ;;  %151 = vrot.lane.b32.xlu1 %v71_v4, %s416_s0 }
  0x26   :  { %153 = vrot.lane.b32.xlu2 %v446_v5, %s416_s0 }
  0x2d   :  { %185 = vrot.lane.b32.xlu0 %v450_v6, %s417_s1  ;;  %187 = vrot.lane.b32.xlu1 %v452_v7, %s417_s1 }
  0x2e   :  { %189 = vrot.lane.b32.xlu2 %v450_v6, %s416_s0 }
  0x35   :  { %191 = vrot.lane.b32.xlu0 %v452_v7, %s416_s0  ;;  %223 = vrot.lane.b32.xlu1 %v457_v8, %s417_s1 }
  0x36   :  { %225 = vrot.lane.b32.xlu2 %v459_v9, %s417_s1 }
  0x3d   :  { %227 = vrot.lane.b32.xlu0 %v457_v8, %s416_s0  ;;  %229 = vrot.lane.b32.xlu1 %v459_v9, %s416_s0 }
  0x68   :  { %v114_v10 = vpop.permute.xlu2 %113 }
  0x70   :  { %v116_v13 = vpop.permute.xlu2 %115 }
  0x78   :  { %v148_v19 = vpop.permute.xlu2 %147 }
  0x7f   :  { %v82_v11 = vpop.permute.xlu1 %81  ;;  %v78_v12 = vpop.permute.xlu0 %77 }
  0x80   :  { %v85_v25 = vsel %vm466_vm0, %v82_v11, %v78_v12  ;;  %v154_v34 = vpop.permute.xlu2 %153  ;;  %v87_v39 = vsel %vm478_vm1, %v78_v12, %v82_v11 }
  0x81   :  { %v89_v31 = vadd.f32 %v85_v25, %v44_v0 }
  0x83   :  { %v91_v43 = vadd.f32 %v89_v31, %v87_v39 }
  0x85   :  { %v93_v56 = vrot.slane %v91_v43, 7  ;;  %v98_v57 = vrot.slane %v91_v43, 1 }
  0x87   :  { %v84_v16 = vpop.permute.xlu1 %83  ;;  %v80_v17 = vpop.permute.xlu0 %79 }
  0x88   :  { %v86_v21 = vsel %vm466_vm0, %v84_v16, %v80_v17  ;;  %v88_v33 = vsel %vm478_vm1, %v80_v17, %v84_v16 }
  0x89   :  { %v90_v26 = vadd.f32 %v86_v21, %v45_v2 }
  0x8b   :  { %v92_v35 = vadd.f32 %v90_v26, %v88_v33 }
  0x8d   :  { %v94_v45 = vrot.slane %v92_v35, 7  ;;  %v99_v46 = vrot.slane %v92_v35, 1 }
  0x8f   :  { %v120_v22 = vpop.permute.xlu1 %119  ;;  %v118_v23 = vpop.permute.xlu0 %117  ;;  %v96_v61 = vsel %vm95_vm2, %v93_v56, %v94_v45  ;;  %v97_v62 = vsel %vm95_vm2, %v94_v45, %v93_v56  ;;  %v101_v63 = vsel %vm100_vm3, %v98_v57, %v99_v46  ;;  %v102_v0 = vsel %vm100_vm3, %v99_v46, %v98_v57 }
  0x90   :  { %v122_v24 = vsel %vm466_vm0, %v120_v22, %v116_v13  ;;  %v121_v27 = vsel %vm466_vm0, %v118_v23, %v114_v10  ;;  %v124_v36 = vsel %vm478_vm1, %v116_v13, %v120_v22  ;;  %v123_v38 = vsel %vm478_vm1, %v114_v10, %v118_v23 }
  0x91   :  { %v126_v28 = vadd.f32 %v122_v24, %v47_v3  ;;  %v125_v30 = vadd.f32 %v121_v27, %v46_v1  ;;  %v190_v1 = vpop.permute.xlu2 %189  ;;  %v103_v16 = vsel %vm67_vm4, %v101_v63, %v97_v62  ;;  %v108_v17 = vadd.f32 %v96_v61, %v92_v35 }
  0x92   :  { %v106_v18 = vsel %vm70_vm5, %v96_v61, %v102_v0  ;;  %v107_v24 = vadd.f32 %v103_v16, %v91_v43 }
  0x93   :  { %v128_v37 = vadd.f32 %v126_v28, %v124_v36  ;;  %v127_v40 = vadd.f32 %v125_v30, %v123_v38  ;;  %v110_v27 = vadd.f32 %v108_v17, %v106_v18 }
  0x94   :  { %v109_v38 = vadd.f32 %v107_v24, %v101_v63 }
  0x95   :  { %v130_v48 = vrot.slane %v128_v37, 7  ;;  %v134_v49 = vrot.slane %v128_v37, 1  ;;  %v129_v52 = vrot.slane %v127_v40, 7  ;;  %v133_v53 = vrot.slane %v127_v40, 1 }
  0x96   :  { %v549_v43 = vmul.f32 0.11111111, %v110_v27 }
  0x97   :  { %v150_v41 = vpop.permute.xlu0 %149  ;;  %v152_v42 = vpop.permute.xlu1 %151  ;;  %v131_v2 = vsel %vm95_vm2, %v129_v52, %v130_v48  ;;  %v132_v3 = vsel %vm95_vm2, %v130_v48, %v129_v52 }
  0x98   :  { %v155_v47 = vsel %vm466_vm0, %v152_v42, %v148_v19  ;;  %v156_v51 = vsel %vm466_vm0, %v154_v34, %v150_v41  ;;  %v157_v54 = vsel %vm478_vm1, %v148_v19, %v152_v42  ;;  %v158_v59 = vsel %vm478_vm1, %v150_v41, %v154_v34 }
  0x99   :  { %v159_v50 = vadd.f32 %v155_v47, %v71_v4  ;;  %v160_v55 = vadd.f32 %v156_v51, %v446_v5  ;;  %v135_v4 = vsel %vm100_vm3, %v133_v53, %v134_v49  ;;  %v136_v5 = vsel %vm100_vm3, %v134_v49, %v133_v53 }
  0x9a   :  { %v142_v19 = vadd.f32 %v131_v2, %v128_v37  ;;  %v137_v22 = vsel %vm67_vm4, %v135_v4, %v132_v3  ;;  %v140_v23 = vsel %vm70_vm5, %v131_v2, %v136_v5  ;;  %v558_v51 = vmul.f32 0.11111111, %v109_v38 }
  0x9b   :  { %v161_v58 = vadd.f32 %v159_v50, %v157_v54  ;;  %v162_v60 = vadd.f32 %v160_v55, %v158_v59  ;;  %v141_v31 = vadd.f32 %v137_v22, %v127_v40 }
  0x9c   :  { %v144_v33 = vadd.f32 %v142_v19, %v140_v23 }
  0x9d   :  { %v163_v12 = vrot.slane %v161_v58, 7  ;;  %v167_v13 = vrot.slane %v161_v58, 1  ;;  %v164_v14 = vrot.slane %v162_v60, 7  ;;  %v168_v15 = vrot.slane %v162_v60, 1 }
  0x9e   :  { %v143_v46 = vadd.f32 %v141_v31, %v135_v4  ;;  %v554_v47 = vmul.f32 0.11111111, %v144_v33 }
  0x9f   :  { %v186_v10 = vpop.permute.xlu0 %185  ;;  %v188_v11 = vpop.permute.xlu1 %187  ;;  %v166_v25 = vsel %vm95_vm2, %v164_v14, %v163_v12  ;;  %v169_v26 = vsel %vm100_vm3, %v167_v13, %v168_v15  ;;  %v165_v28 = vsel %vm95_vm2, %v163_v12, %v164_v14  ;;  %v170_v34 = vsel %vm100_vm3, %v168_v15, %v167_v13 }
  0xa0   :  { %v193_v21 = vsel %vm466_vm0, %v190_v1, %v186_v10  ;;  %v171_v35 = vsel %vm67_vm4, %v169_v26, %v166_v25  ;;  %v176_v39 = vadd.f32 %v165_v28, %v162_v60  ;;  %v195_v41 = vsel %vm478_vm1, %v186_v10, %v190_v1  ;;  %v226_v60 = vpop.permute.xlu2 %225 }
  0xa1   :  { %v197_v30 = vadd.f32 %v193_v21, %v450_v6  ;;  %v174_v6 = vsel %vm70_vm5, %v165_v28, %v170_v34  ;;  %v175_v48 = vadd.f32 %v171_v35, %v161_v58  ;;  %v560_v57 = vmul.f32 0.11111111, %v143_v46 }
  0xa2   :  { %v178_v52 = vadd.f32 %v176_v39, %v174_v6  ;;  %v220_v58 = vmul.f32 %v554_v47, %v554_v47 }
  0xa3   :  { %v199_v40 = vadd.f32 %v197_v30, %v195_v41  ;;  %v177_v59 = vadd.f32 %v175_v48, %v169_v26  ;;  %v219_v19 = vmul.f32 %v560_v57, %v560_v57  ;;  %v257_v32 = vmul.f32 %v560_v57, %v558_v51 }
  0xa5   :  { %v201_v53 = vrot.slane %v199_v40, 7  ;;  %v205_v54 = vrot.slane %v199_v40, 1  ;;  %v179_v21 = vmul.f32 0.11111111, %v177_v59 }
  0xa7   :  { %v192_v36 = vpop.permute.xlu0 %191  ;;  %v224_v37 = vpop.permute.xlu1 %223 }
  0xa8   :  { %v194_v42 = vsel %vm466_vm0, %v192_v36, %v188_v11  ;;  %v196_v49 = vsel %vm478_vm1, %v188_v11, %v192_v36  ;;  %v180_v11 = vmul.f32 0.11111111, %v178_v52 }
  0xa9   :  { %v198_v45 = vadd.f32 %v194_v42, %v452_v7  ;;  %v182_v7 = vmul.f32 %v549_v43, %v549_v43 }
  0xab   :  { %v200_v50 = vadd.f32 %v198_v45, %v196_v49  ;;  %v274_v25 = vadd.f32 %v220_v58, %v182_v7  ;;  %v184_v30 = vsub.f32 %v180_v11, %v182_v7 }
  0xad   :  { %v202_v55 = vrot.slane %v200_v50, 7  ;;  %v206_v56 = vrot.slane %v200_v50, 1  ;;  %v276_v45 = vadd.f32 0.0001, %v274_v25 }
  0xaf   :  { %v203_v61 = vsel %vm95_vm2, %v201_v53, %v202_v55  ;;  %v204_v62 = vsel %vm95_vm2, %v202_v55, %v201_v53  ;;  %v207_v63 = vsel %vm100_vm3, %v205_v54, %v206_v56  ;;  %v208_v0 = vsel %vm100_vm3, %v206_v56, %v205_v54  ;;  %v228_v1 = vpop.permute.xlu0 %227  ;;  %v230_v2 = vpop.permute.xlu1 %229 }
  0xb0   :  { %v209_v3 = vsel %vm67_vm4, %v207_v63, %v204_v62  ;;  %v212_v4 = vsel %vm70_vm5, %v203_v61, %v208_v0  ;;  %v214_v5 = vadd.f32 %v203_v61, %v200_v50  ;;  %v231_v10 = vsel %vm466_vm0, %v228_v1, %v224_v37 }
  0xb1   :  { %v213_v12 = vadd.f32 %v209_v3, %v199_v40  ;;  %v235_v13 = vadd.f32 %v231_v10, %v457_v8  ;;  %v232_v14 = vsel %vm466_vm0, %v230_v2, %v226_v60  ;;  %v233_v16 = vsel %vm478_vm1, %v224_v37, %v228_v1 }
  0xb2   :  { %v216_v15 = vadd.f32 %v214_v5, %v212_v4  ;;  %v234_v17 = vsel %vm478_vm1, %v226_v60, %v230_v2  ;;  %v236_v18 = vadd.f32 %v232_v14, %v459_v9  ;;  %v181_v8 = vmul.f32 %v558_v51, %v558_v51 }
  0xb3   :  { %v215_v22 = vadd.f32 %v213_v12, %v207_v63  ;;  %v237_v23 = vadd.f32 %v235_v13, %v233_v16  ;;  %v258_v56 = vmul.f32 %v554_v47, %v549_v43  ;;  %v262_v61 = vmul.f32 2.0, %v549_v43 }
  0xb4   :  { %v218_v20 = vmul.f32 0.11111111, %v216_v15  ;;  %v238_v24 = vadd.f32 %v236_v18, %v234_v17  ;;  %v273_v9 = vadd.f32 %v219_v19, %v181_v8  ;;  %v183_v34 = vsub.f32 %v179_v21, %v181_v8 }
  0xb5   :  { %v217_v26 = vmul.f32 0.11111111, %v215_v22  ;;  %v239_v27 = vrot.slane %v237_v23, 7  ;;  %v243_v28 = vrot.slane %v237_v23, 1  ;;  %v261_v63 = vmul.f32 2.0, %v558_v51 }
  0xb6   :  { %v222_v29 = vsub.f32 %v218_v20, %v220_v58  ;;  %v240_v31 = vrot.slane %v238_v24, 7  ;;  %v244_v33 = vrot.slane %v238_v24, 1  ;;  %v275_v50 = vadd.f32 0.0001, %v273_v9 }
  0xb7   :  { %v221_v35 = vsub.f32 %v217_v26, %v219_v19  ;;  %v264_v1 = vmul.f32 %v262_v61, %v554_v47  ;;  %v263_v3 = vmul.f32 %v261_v63, %v560_v57 }
  0xb8   :  { %v278_v36 = vadd.f32 %v222_v29, %v184_v30  ;;  %v241_v37 = vsel %vm95_vm2, %v239_v27, %v240_v31  ;;  %v242_v38 = vsel %vm95_vm2, %v240_v31, %v239_v27  ;;  %v245_v39 = vsel %vm100_vm3, %v243_v28, %v244_v33 }
  0xb9   :  { %v277_v41 = vadd.f32 %v221_v35, %v183_v34  ;;  %v246_v42 = vsel %vm100_vm3, %v244_v33, %v243_v28  ;;  %v247_v6 = vsel %vm67_vm4, %v245_v39, %v242_v38  ;;  %v252_v40 = vadd.f32 %v241_v37, %v238_v24 }
  0xba   :  { %v280_v46 = vadd.f32 0.0009, %v278_v36  ;;  %v250_v48 = vsel %vm70_vm5, %v241_v37, %v246_v42  ;;  %v251_v49 = vadd.f32 %v247_v6, %v237_v23  ;;  %v266_v13 = vadd.f32 0.0001, %v264_v1 }
  0xbb   :  { %v279_v52 = vadd.f32 0.0009, %v277_v41  ;;  %v254_v53 = vadd.f32 %v252_v40, %v250_v48  ;;  %v265_v15 = vadd.f32 0.0001, %v263_v3 }
  0xbc   :  { %v253_v54 = vadd.f32 %v251_v49, %v245_v39  ;;  %v282_v55 = vmul.f32 %v280_v46, %v276_v45 }
  0xbd   :  { %v256_v7 = vmul.f32 0.11111111, %v254_v53  ;;  %v281_v59 = vmul.f32 %v279_v52, %v275_v50 }
  0xbe   :  { %v255_v58 = vmul.f32 0.11111111, %v253_v54  ;;  %330 = vrcp.f32 %v282_v55 }
  0xbf   :  { %v260_v60 = vsub.f32 %v256_v7, %v258_v56  ;;  %332 = vrcp.f32 %v281_v59 }
  0xc0   :  { %v259_v44 = vsub.f32 %v255_v58, %v257_v32 }
  0xc1   :  { %v268_v62 = vmul.f32 2.0, %v260_v60 }
  0xc2   :  { %v267_v0 = vmul.f32 2.0, %v259_v44 }
  0xc3   :  { %v270_v5 = vadd.f32 0.0009, %v268_v62 }
  0xc4   :  { %v331_v2 = vpop.eup %330  ;;  %v269_v11 = vadd.f32 0.0009, %v267_v0 }
  0xc5   :  { %v333_v4 = vpop.eup %332  ;;  %v286_v10 = vmul.f32 %v331_v2, %v282_v55  ;;  %v272_v17 = vmul.f32 %v270_v5, %v266_v13 }
  0xc6   :  { %v285_v12 = vmul.f32 %v333_v4, %v281_v59  ;;  %v271_v18 = vmul.f32 %v269_v11, %v265_v15 }
  0xc7   :  { %v288_v14 = vsub.f32 2.0, %v286_v10 }
  0xc8   :  { %v287_v16 = vsub.f32 2.0, %v285_v12 }
  0xc9   :  { %v290_v43 = vmul.f32 %v331_v2, %v288_v14 }
  0xca   :  { %v289_v19 = vmul.f32 %v333_v4, %v287_v16 }
  0xcb   :  { %v292_v51 = vmul.f32 %v290_v43, %v272_v17 }
  0xcc   :  { %v291_v21 = vmul.f32 %v289_v19, %v271_v18 }
  0xcd   :  { %v294_v22 = vsub.f32 1.0, %v292_v51 }
  0xce   :  { %v293_v47 = vsub.f32 1.0, %v291_v21 }
  0xcf   :  { %v296_v23 = vmul.f32 0.5, %v294_v22 }
  0xd0   :  { %v295_v8 = vmul.f32 0.5, %v293_v47 }
  0xd1   :  { %v298_v57 = vmax.f32 %v296_v23, 0.0 }
  0xd2   :  { %v297_v20 = vmax.f32 %v295_v8, 0.0 }
  0xd3   :  { %v300_v24 = vmin.f32 %v298_v57, 1.0 }
  0xd4   :  { %v299_v25 = vmin.f32 %v297_v20, 1.0 }
  0xd5   :  { %302 = vst [vmem:[#allocation7 + $0x8] sm:$0xff] %v300_v24 }
  0xd6   :  { %301 = vst [vmem:[#allocation7] sm:$0xff] %v299_v25 }
  0xd7   :  { %315 = dma.vmem_to_hbm [thread:$0]  %s308_s22, 256, %s310_s25, [#allocation4], %s413_s17, %s413_s17, %s414_s18  }
  0xd8   :  { %410 = dma.done.wait [#allocation4], 256  }
  0xd9   :  { %411 = vsyncadd [#allocation4], 4294967040 }
  0xda   :  { %320 = vsyncpa [#allocation3], 1 }
  0xdb   :  { %321 = vsyncpa [#allocation6], 1 }
  0xdc   :  { %322 = vsyncpa [#allocation4], 1 }

</bundles_post_ra>
